<compile_context>
chip_gen: v7x
topology: tpu7x:2x2x1
jax: 0.10.0
libtpu: 0.0.40
codegen_flags: <defaults>
</compile_context>

<pallas_src>
import jax
import jax.numpy as jnp
from jax import lax
from jax.experimental import pallas as pl
from jax.experimental.pallas import tpu as pltpu


# ----------------------------------------------------------------------------
# Pallas kernel: fused 3-layer MLP on one batch tile of TB rows.
# ----------------------------------------------------------------------------
def critic_kernel(s_ref, a_ref, w1s_ref, w1a_ref, b1_ref,
                  w2_ref, b2_ref, w3_ref, b3_ref, o_ref):
    s = s_ref[...]                                        # (TB, Ds) f32
    a = a_ref[...]                                        # (TB, Da) f32

    # fc1: state term on the MXU; action term (K = Da, far below useful MXU
    # contraction depth) as Da broadcast-FMAs on the VPU.
    h1 = jnp.dot(s, w1s_ref[...], preferred_element_type=jnp.float32)
    w1a = w1a_ref[...]                                    # (Da, H1) f32
    for j in range(w1a.shape[0]):                         # Da is tiny & static
        h1 = h1 + a[:, j:j + 1] * w1a[j:j + 1, :]
    h1 = jnp.maximum(h1 + b1_ref[...], 0.0)               # (TB, H1) f32

    # fc2: bf16 MXU operands, f32 accumulation / elementwise.
    h2 = jnp.dot(h1.astype(jnp.bfloat16), w2_ref[...],
                 preferred_element_type=jnp.float32)
    h2 = jnp.maximum(h2 + b2_ref[...], 0.0)               # (TB, H2) f32

    # q head (out_features = 1): contract h2's lane axis against the W3 row
    # to get a lane-dense (1, TB) output row.
    q = lax.dot_general(w3_ref[...], h2,
                        dimension_numbers=(((1,), (1,)), ((), ())),
                        preferred_element_type=jnp.float32)   # (1, TB)
    o_ref[...] = (q + b3_ref[0, 0])[None]                 # (1, 1, TB)


# ----------------------------------------------------------------------------
# Tiling helper: 16-row tiles for tiny batches, 128-aligned tiles (>= 2 grid
# steps, so v7x's two TensorCores are both used) for batches >= 256.
# ----------------------------------------------------------------------------
def _round_up(x, m):
    return ((x + m - 1) // m) * m


def _choose_tiles(batch, tile_b):
    b16 = _round_up(batch, 16)
    if b16 < 256:
        return b16, b16                       # single small tile
    tb = min(_round_up(tile_b, 128), max(128, _round_up((b16 + 1) // 2, 128)))
    return tb, _round_up(batch, tb)


# ----------------------------------------------------------------------------
# Wrapper: batch-tiled pallas_call; weights resident across grid steps.
# ----------------------------------------------------------------------------
def critic_forward(state, action, params, tile_b=512):
    """state: (B, input_dims), action: (B, n_actions) -> q: (B, 1) float32."""
    w1s, w1a, b1, w2, b2, w3_row, b3 = params
    B, Ds = state.shape
    Da = action.shape[1]
    H1 = w1s.shape[1]
    H2 = w2.shape[1]

    TB, B_pad = _choose_tiles(B, tile_b)
    grid_steps = B_pad // TB

    state = state.astype(jnp.float32)
    action = action.astype(jnp.float32)
    if B_pad != B:                             # skip the pad when not needed
        pad = ((0, B_pad - B), (0, 0))
        state = jnp.pad(state, pad)
        action = jnp.pad(action, pad)

    def resident(shape):
        # Same block every grid step -> weights stay resident in VMEM.
        return pl.BlockSpec(shape, lambda i: (0, 0))

    flops = 2 * B_pad * (Ds * H1 + Da * H1 + H1 * H2 + H2)
    bytes_accessed = (
        (B_pad * Ds + B_pad * Da + B_pad) * 4
        + (w1s.size + w1a.size + b1.size + b2.size + w3_row.size + b3.size) * 4
        + w2.size * 2)

    out = pl.pallas_call(
        critic_kernel,
        out_shape=jax.ShapeDtypeStruct((grid_steps, 1, TB), jnp.float32),
        grid=(grid_steps,),
        in_specs=[
            pl.BlockSpec((TB, Ds), lambda i: (i, 0)),     # state tile (f32)
            pl.BlockSpec((TB, Da), lambda i: (i, 0)),     # action tile (f32)
            resident((Ds, H1)),                            # W1[:Ds]  (f32)
            resident((Da, H1)),                            # W1[Ds:]  (f32)
            resident((1, H1)),                             # b1       (f32)
            resident((H1, H2)),                            # W2       (bf16)
            resident((1, H2)),                             # b2       (f32)
            resident((1, H2)),                             # W3 row   (f32)
            pl.BlockSpec(memory_space=pltpu.MemorySpace.SMEM),  # b3 scalar
        ],
        out_specs=pl.BlockSpec((1, 1, TB), lambda i: (i, 0, 0)),
        compiler_params=pltpu.CompilerParams(
            dimension_semantics=("parallel",),
        ),
        cost_estimate=pl.CostEstimate(
            flops=flops, transcendentals=0, bytes_accessed=bytes_accessed),
    )(state, action, w1s, w1a, b1, w2, b2, w3_row, b3)

    return out.reshape(B_pad, 1)[:B]


# ----------------------------------------------------------------------------
# Deterministic parameter init (mirrors nn.Linear default U(-1/sqrt(fan_in),+)).
# Dtypes fixed once here: only W2 is bf16; fc1 weights / biases / head are f32.
# W1 is returned pre-split along its input axis; W3 as a (1, H2) row.
# ----------------------------------------------------------------------------
def init_params(key, input_dims, n_actions, fc_dims=(256, 256)):
    sizes = [input_dims + n_actions] + list(fc_dims) + [1]
    raw = []
    for i in range(len(sizes) - 1):
        fan_in, fan_out = sizes[i], sizes[i + 1]
        key, kw, kb = jax.random.split(key, 3)
        bound = 1.0 / float(fan_in) ** 0.5
        w = jax.random.uniform(kw, (fan_in, fan_out), jnp.float32, -bound, bound)
        b = jax.random.uniform(kb, (1, fan_out), jnp.float32, -bound, bound)
        raw += [w, b]
    w1, b1, w2, b2, w3, b3 = raw
    w1s, w1a = w1[:input_dims], w1[input_dims:]
    return (w1s, w1a, b1, w2.astype(jnp.bfloat16), b2, w3.T, b3)


# ----------------------------------------------------------------------------
# Pure-JAX f32 reference for the sanity check.
# ----------------------------------------------------------------------------
def critic_ref(state, action, params):
    w1s, w1a, b1, w2, b2, w3_row, b3 = [p.astype(jnp.float32) for p in params]
    h = jnp.maximum(state @ w1s + action @ w1a + b1, 0.0)
    h = jnp.maximum(h @ w2 + b2, 0.0)
    return h @ w3_row.T + b3


if __name__ == "__main__":
    input_dims = 8
    n_actions = 2

    key = jax.random.PRNGKey(0)
    k_params, k_state, k_action = jax.random.split(key, 3)
    params = init_params(k_params, input_dims, n_actions)

    # Small-shape check (B=2): single 16-row tile, padded internally.
    B = 2
    state = jax.random.normal(k_state, (B, input_dims), jnp.float32)
    action = jax.random.normal(k_action, (B, n_actions), jnp.float32)
    q = jax.block_until_ready(critic_forward(state, action, params))
    q_ref = critic_ref(state, action, params)
    assert q.shape == (B, 1), q.shape
    # bf16 W2 operand with f32 accumulation -> relaxed tolerance vs f32 ref.
    assert jnp.allclose(q, q_ref, atol=2e-2, rtol=2e-2), (q, q_ref)

    # Multi-tile check (B=300): exercises the 128-aligned multi-step grid
    # (2 x 256-row tiles) and the padding / lane-dense output path.
    B2 = 300
    k_s2, k_a2 = jax.random.split(jax.random.PRNGKey(1))
    state2 = jax.random.normal(k_s2, (B2, input_dims), jnp.float32)
    action2 = jax.random.normal(k_a2, (B2, n_actions), jnp.float32)
    q2 = jax.block_until_ready(critic_forward(state2, action2, params))
    q2_ref = critic_ref(state2, action2, params)
    assert q2.shape == (B2, 1), q2.shape
    assert jnp.allclose(q2, q2_ref, atol=2e-2, rtol=2e-2)

    # TODO(synk): checkpoint save/load and the Adam optimizer are host-side /
    # training concerns with no Pallas forward-pass equivalent.
    print("KERNEL_OK")
</pallas_src>

<mosaic_0001>
module attributes {stable_mosaic.version = 11 : i64} {
  func.func @critic_kernel(%arg0: i32, %arg1: memref<16x8xf32, #tpu.memory_space<vmem>>, %arg2: memref<16x2xf32, #tpu.memory_space<vmem>>, %arg3: memref<8x256xf32, #tpu.memory_space<vmem>>, %arg4: memref<2x256xf32, #tpu.memory_space<vmem>>, %arg5: memref<1x256xf32, #tpu.memory_space<vmem>>, %arg6: memref<256x256xbf16, #tpu.memory_space<vmem>>, %arg7: memref<1x256xf32, #tpu.memory_space<vmem>>, %arg8: memref<1x256xf32, #tpu.memory_space<vmem>>, %arg9: memref<1x1xf32, #tpu.memory_space<smem>>, %arg10: memref<1x1x16xf32, #tpu.memory_space<vmem>>) attributes {dimension_semantics = [#tpu.dimension_semantics<parallel>], iteration_bounds = array<i64: 1>, scalar_prefetch = 0 : i64, scratch_operands = 0 : i64, tpu.core_type = #tpu.core_type<tc>, window_params = [{transform_indices = @transform_0, window_bounds = array<i64: 16, 8>}, {transform_indices = @transform_1, window_bounds = array<i64: 16, 2>}, {pipeline_mode = #tpu.pipeline_mode<synchronous>, transform_indices = @transform_2, window_bounds = array<i64: 8, 256>}, {pipeline_mode = #tpu.pipeline_mode<synchronous>, transform_indices = @transform_3, window_bounds = array<i64: 2, 256>}, {pipeline_mode = #tpu.pipeline_mode<synchronous>, transform_indices = @transform_4, window_bounds = array<i64: 1, 256>}, {pipeline_mode = #tpu.pipeline_mode<synchronous>, transform_indices = @transform_5, window_bounds = array<i64: 256, 256>}, {pipeline_mode = #tpu.pipeline_mode<synchronous>, transform_indices = @transform_6, window_bounds = array<i64: 1, 256>}, {pipeline_mode = #tpu.pipeline_mode<synchronous>, transform_indices = @transform_7, window_bounds = array<i64: 1, 256>}, {transform_indices = @transform_8, window_bounds = array<i64: 1, 1>}, {transform_indices = @transform_9, window_bounds = array<i64: 1, 1, 16>}]} {
    %c0 = arith.constant 0 : index
    %c0_0 = arith.constant 0 : index
    %0 = vector.load %arg1[%c0, %c0_0] : memref<16x8xf32, #tpu.memory_space<vmem>>, vector<16x8xf32>
    %c0_1 = arith.constant 0 : index
    %c0_2 = arith.constant 0 : index
    %1 = vector.load %arg2[%c0_1, %c0_2] : memref<16x2xf32, #tpu.memory_space<vmem>>, vector<16x2xf32>
    %c0_3 = arith.constant 0 : index
    %c0_4 = arith.constant 0 : index
    %2 = vector.load %arg3[%c0_3, %c0_4] : memref<8x256xf32, #tpu.memory_space<vmem>>, vector<8x256xf32>
    %cst = arith.constant dense<0.000000e+00> : vector<16x256xf32>
    %3 = tpu.matmul %0, %2, %cst {dimension_numbers = #tpu.dot_dimension_numbers<[1], [0], [0], [1], [0, 0, 1, 1], [], []>} : vector<16x8xf32>, vector<8x256xf32>, vector<16x256xf32> -> vector<16x256xf32>
    %c0_5 = arith.constant 0 : index
    %c0_6 = arith.constant 0 : index
    %4 = vector.load %arg4[%c0_5, %c0_6] : memref<2x256xf32, #tpu.memory_space<vmem>>, vector<2x256xf32>
    %5 = vector.extract_strided_slice %1 {offsets = [0, 0], sizes = [16, 1], strides = [1, 1]} : vector<16x2xf32> to vector<16x1xf32>
    %6 = vector.extract_strided_slice %4 {offsets = [0, 0], sizes = [1, 256], strides = [1, 1]} : vector<2x256xf32> to vector<1x256xf32>
    %7 = vector.broadcast %5 : vector<16x1xf32> to vector<16x256xf32>
    %8 = vector.broadcast %6 : vector<1x256xf32> to vector<16x256xf32>
    %9 = arith.mulf %7, %8 : vector<16x256xf32>
    %10 = arith.addf %3, %9 : vector<16x256xf32>
    %11 = vector.extract_strided_slice %1 {offsets = [0, 1], sizes = [16, 1], strides = [1, 1]} : vector<16x2xf32> to vector<16x1xf32>
    %12 = vector.extract_strided_slice %4 {offsets = [1, 0], sizes = [1, 256], strides = [1, 1]} : vector<2x256xf32> to vector<1x256xf32>
    %13 = vector.broadcast %11 : vector<16x1xf32> to vector<16x256xf32>
    %14 = vector.broadcast %12 : vector<1x256xf32> to vector<16x256xf32>
    %15 = arith.mulf %13, %14 : vector<16x256xf32>
    %16 = arith.addf %10, %15 : vector<16x256xf32>
    %c0_7 = arith.constant 0 : index
    %c0_8 = arith.constant 0 : index
    %17 = vector.load %arg5[%c0_7, %c0_8] : memref<1x256xf32, #tpu.memory_space<vmem>>, vector<1x256xf32>
    %18 = vector.broadcast %17 : vector<1x256xf32> to vector<16x256xf32>
    %19 = arith.addf %16, %18 : vector<16x256xf32>
    %cst_9 = arith.constant 0.000000e+00 : f32
    %20 = vector.broadcast %cst_9 : f32 to vector<16x256xf32>
    %21 = arith.maximumf %19, %20 : vector<16x256xf32>
    %22 = arith.truncf %21 : vector<16x256xf32> to vector<16x256xbf16>
    %c0_10 = arith.constant 0 : index
    %c0_11 = arith.constant 0 : index
    %23 = vector.load %arg6[%c0_10, %c0_11] : memref<256x256xbf16, #tpu.memory_space<vmem>>, vector<256x256xbf16>
    %cst_12 = arith.constant dense<0.000000e+00> : vector<16x256xf32>
    %24 = tpu.matmul %22, %23, %cst_12 {dimension_numbers = #tpu.dot_dimension_numbers<[1], [0], [0], [1], [0, 0, 1, 1], [], []>} : vector<16x256xbf16>, vector<256x256xbf16>, vector<16x256xf32> -> vector<16x256xf32>
    %c0_13 = arith.constant 0 : index
    %c0_14 = arith.constant 0 : index
    %25 = vector.load %arg7[%c0_13, %c0_14] : memref<1x256xf32, #tpu.memory_space<vmem>>, vector<1x256xf32>
    %26 = vector.broadcast %25 : vector<1x256xf32> to vector<16x256xf32>
    %27 = arith.addf %24, %26 : vector<16x256xf32>
    %cst_15 = arith.constant 0.000000e+00 : f32
    %28 = vector.broadcast %cst_15 : f32 to vector<16x256xf32>
    %29 = arith.maximumf %27, %28 : vector<16x256xf32>
    %c0_16 = arith.constant 0 : index
    %c0_17 = arith.constant 0 : index
    %30 = vector.load %arg8[%c0_16, %c0_17] : memref<1x256xf32, #tpu.memory_space<vmem>>, vector<1x256xf32>
    %cst_18 = arith.constant dense<0.000000e+00> : vector<1x16xf32>
    %31 = tpu.matmul %30, %29, %cst_18 {dimension_numbers = #tpu.dot_dimension_numbers<[1], [1], [0], [0], [0, 0, 1, 0], [], []>} : vector<1x256xf32>, vector<16x256xf32>, vector<1x16xf32> -> vector<1x16xf32>
    %c0_19 = arith.constant 0 : index
    %c0_20 = arith.constant 0 : index
    %32 = memref.load %arg9[%c0_19, %c0_20] : memref<1x1xf32, #tpu.memory_space<smem>>
    %33 = vector.broadcast %32 : f32 to vector<1x16xf32>
    %34 = arith.addf %31, %33 : vector<1x16xf32>
    %35 = vector.shape_cast %34 : vector<1x16xf32> to vector<1x1x16xf32>
    %c0_21 = arith.constant 0 : index
    %c0_22 = arith.constant 0 : index
    %c0_23 = arith.constant 0 : index
    %36 = vector.load %arg10[%c0_21, %c0_22, %c0_23] : memref<1x1x16xf32, #tpu.memory_space<vmem>>, vector<1x1x16xf32>
    tpu.vector_store %arg10[%c0_21, %c0_22, %c0_23], %35 {strides = array<i32>} : memref<1x1x16xf32, #tpu.memory_space<vmem>>, vector<1x1x16xf32>,
    return
  }
  func.func @transform_0(%arg0: i32) -> (i32, i32) {
    %c0_i32 = arith.constant 0 : i32
    %c0_i32_0 = arith.constant 0 : i32
    return %arg0, %c0_i32 : i32, i32
  }
  func.func @transform_1(%arg0: i32) -> (i32, i32) {
    %c0_i32 = arith.constant 0 : i32
    %c0_i32_0 = arith.constant 0 : i32
    return %arg0, %c0_i32 : i32, i32
  }
  func.func @transform_2(%arg0: i32) -> (i32, i32) {
    %c0_i32 = arith.constant 0 : i32
    %c0_i32_0 = arith.constant 0 : i32
    %c0_i32_1 = arith.constant 0 : i32
    return %c0_i32, %c0_i32_0 : i32, i32
  }
  func.func @transform_3(%arg0: i32) -> (i32, i32) {
    %c0_i32 = arith.constant 0 : i32
    %c0_i32_0 = arith.constant 0 : i32
    %c0_i32_1 = arith.constant 0 : i32
    return %c0_i32, %c0_i32_0 : i32, i32
  }
  func.func @transform_4(%arg0: i32) -> (i32, i32) {
    %c0_i32 = arith.constant 0 : i32
    %c0_i32_0 = arith.constant 0 : i32
    %c0_i32_1 = arith.constant 0 : i32
    return %c0_i32, %c0_i32_0 : i32, i32
  }
  func.func @transform_5(%arg0: i32) -> (i32, i32) {
    %c0_i32 = arith.constant 0 : i32
    %c0_i32_0 = arith.constant 0 : i32
    %c0_i32_1 = arith.constant 0 : i32
    return %c0_i32, %c0_i32_0 : i32, i32
  }
  func.func @transform_6(%arg0: i32) -> (i32, i32) {
    %c0_i32 = arith.constant 0 : i32
    %c0_i32_0 = arith.constant 0 : i32
    %c0_i32_1 = arith.constant 0 : i32
    return %c0_i32, %c0_i32_0 : i32, i32
  }
  func.func @transform_7(%arg0: i32) -> (i32, i32) {
    %c0_i32 = arith.constant 0 : i32
    %c0_i32_0 = arith.constant 0 : i32
    %c0_i32_1 = arith.constant 0 : i32
    return %c0_i32, %c0_i32_0 : i32, i32
  }
  func.func @transform_8(%arg0: i32) -> (i32, i32) {
    %c0_i32 = arith.constant 0 : i32
    %c0_i32_0 = arith.constant 0 : i32
    %c0_i32_1 = arith.constant 0 : i32
    return %c0_i32, %c0_i32_0 : i32, i32
  }
  func.func @transform_9(%arg0: i32) -> (i32, i32, i32) {
    %c0_i32 = arith.constant 0 : i32
    %c0_i32_0 = arith.constant 0 : i32
    %c0_i32_1 = arith.constant 0 : i32
    return %arg0, %c0_i32, %c0_i32_0 : i32, i32, i32
  }
}

</mosaic_0001>

<bundles_post_ra>
// kernel: tpu_custom_call.1
= control target key start
LH: loop header
LB: loop body
LE: loop exit
PB: predicated region body
PF: predicated region fallthrough
CT: control target
= control target key end

     0   :  { %15 = vsyncpa [#allocation4], 0  ;;  %s848_s0 = inlined_call_operand.vmem [shape: f32[16,8], index: 0, kind: input, shape index: {}]   ;;  %s849_s1 = inlined_call_operand.vmem [shape: f32[16,2], index: 1, kind: input, shape index: {}]   ;;  %s850_s2 = inlined_call_operand.vmem [shape: f32[8,256], index: 2, kind: input, shape index: {}]   ;;  %s851_s3 = inlined_call_operand.vmem [shape: f32[2,256], index: 3, kind: input, shape index: {}]   ;;  %s852_s4 = inlined_call_operand.vmem [shape: f32[1,256], index: 4, kind: input, shape index: {}]   ;;  %s853_s5 = inlined_call_operand.hbm [shape: bf16[256,256], index: 5, kind: input, shape index: {}]   ;;  %s854_s6 = inlined_call_operand.vmem [shape: f32[1,256], index: 6, kind: input, shape index: {}]   ;;  %s855_s7 = inlined_call_operand.vmem [shape: f32[1,256], index: 7, kind: input, shape index: {}]   ;;  %s856_s8 = inlined_call_operand.<no memory space> [shape: f32[1,1], index: 8, kind: input, shape index: {}]   ;;  %s857_s9 = inlined_call_operand.hbm [shape: f32[1,1,16], index: 9, kind: output, shape index: {}]  }
   0x1   :  { %16 = vsyncpa [#allocation5], 0  ;;  %s724_s30 = smov [#allocation3]   ;;  %s676_s13 = scalar_lea.hbm %s853_s5, 4096 }
   0x2   :  { %s32_s10 = sshll.u32 %s724_s30, 4  ;;  %p677_p0 = scmp.ne.s32.totalorder %s853_s5, %s676_s13  ;;  %s33_s10 = int_to_ptr.vmem [resolvable:$true] %s32_s10 }
   0x3   :  { %p680_p1 = scmp.lt.u32.totalorder %s676_s13, %s853_s5 }
   0x5   :  { %p682_p2 = pnand %p680_p1, %p677_p0 }
   0x7   :  { %685 = shalt.err (!%p682_p2)
}
   0x8   :  { %s686_s18 = scalar_lea.vmem %s33_s10, 4096  ;;  %p691_p4 = scmp.lt.s32.totalorder %s33_s10, %s33_s10 }
   0x9   :  { %p687_p3 = scmp.ne.s32.totalorder %s33_s10, %s686_s18  ;;  %p692_p5 = scmp.lt.s32.totalorder %s686_s18, %s686_s18 }
   0xb   :  { %p693_p6 = por %p692_p5, %p691_p4 }
   0xd   :  { %p694_p7 = pnand %p693_p6, %p687_p3 }
   0xf   :  { %697 = shalt.err (!%p694_p7)
}
  0x10   :  { %s725_s19 = smov 128   ;;  %s726_s20 = smov 8  }
  0x11   :  { %38 = dma.hbm_to_vmem [thread:$0]  %s853_s5, 4096, %s33_s10, [#allocation4], %s725_s19, %s725_s19, %s726_s20  }
  0x12   :  { %720 = dma.done.wait [#allocation4], 4096  }
  0x13   :  { %721 = vsyncadd [#allocation4], 4294963200  ;;  %v727_v0 = vmov 0.0   ;;  %v728_v1 = vmov 0   ;;  %v729_v2 = vmov 1   ;;  %v53_v3 = vld [vmem:[%s850_s2 + $0x8] sm:$0xff]  ;;  %v66_v41 = vlaneseq }
  0x14   :  { %159 = vmatprep.mubr.f32.mxu0 %v727_v0  ;;  %625 = vset.pattern.permute.xlu0 %v728_v1  ;;  %v52_v4 = vld [vmem:[%s850_s2] sm:$0xff]  ;;  %vm88_vm0 = vcmask 64512   ;;  %v51_v7 = vld [vmem:[%s849_s1 + $0x8] sm:$0xff]  ;;  %v631_v11 = vld [vmem:[#allocation3 + $0x14] ss:$8 sps:$4 sm:$0xff]   ;;  %s730_s16 = smov [#allocation6]  }
  0x15   :  { %626 = vset.pattern.permute.xlu1 %v729_v2  ;;  %v48_v5 = vld [vmem:[%s848_s0] sm:$0xff]  ;;  %95 = vmatprep.subr.mxu0 %v53_v3  ;;  %v49_v10 = vld [vmem:[%s848_s0 + $0x8] sm:$0xff]  ;;  %v633_v12 = vld [vmem:[#allocation3 + $0x10] ss:$8 sps:$4 sm:$0xff]   ;;  %v67_v42 = vshrl.u32 %v66_v41, 7  ;;  %s571_s17 = sshll.u32 %s730_s16, 4  ;;  %s572_s17 = int_to_ptr.vmem [resolvable:$true] %s571_s17 }
  0x16   :  { %v50_v6 = vld [vmem:[%s849_s1] sm:$0xff]  ;;  %96 = vmatpush1.msra.mxu0 %v52_v4  ;;  %v637_v15 = vld [vmem:[#allocation3 + $0x34] ss:$8 sps:$4 sm:$0xff]   ;;  %v639_v16 = vld [vmem:[#allocation3 + $0x30] ss:$8 sps:$4 sm:$0xff]   ;;  %vm563_vm1 = vcmask 122880   ;;  %p703_p9 = scmp.lt.s32.totalorder %s572_s17, %s572_s17 }
  0x17   :  { %57 = vperm.xlu0 %625, %v50_v6   ;;  %v628_v8 = vld [vmem:[#allocation3 + $0x4] ss:$8 sps:$4 sm:$0xff]   ;;  %580 = vmatmul.mubr.msk.f32.vlgmr.msra.gmra.mrb[0].mxu0 %vm88_vm0, %v48_v5  ;;  %v630_v9 = vld [vmem:[#allocation3] ss:$8 sps:$4 sm:$0xff]   ;;  %v643_v19 = vld [vmem:[#allocation3 + $0x54] ss:$8 sps:$4 sm:$0xff]  }
  0x18   :  { %173 = vperm.xlu1 %626, %v50_v6   ;;  %165 = vmatprep.mubr.f32.mxu0 %v727_v0  ;;  %v634_v13 = vld [vmem:[#allocation3 + $0x24] ss:$8 sps:$4 sm:$0xff]   ;;  %v636_v14 = vld [vmem:[#allocation3 + $0x20] ss:$8 sps:$4 sm:$0xff]   ;;  %v645_v20 = vld [vmem:[#allocation3 + $0x50] ss:$8 sps:$4 sm:$0xff]  }
  0x19   :  { %432 = vmatprep.subr.bf16.mxu1 %v628_v8  ;;  %v640_v17 = vld [vmem:[#allocation3 + $0x44] ss:$8 sps:$4 sm:$0xff]   ;;  %v642_v18 = vld [vmem:[#allocation3 + $0x40] ss:$8 sps:$4 sm:$0xff]   ;;  %v649_v23 = vld [vmem:[#allocation3 + $0x74] ss:$8 sps:$4 sm:$0xff]  }
  0x1a   :  { %433 = vmatpush1.bf16.msra.mxu1 %v630_v9  ;;  %v646_v21 = vld [vmem:[#allocation3 + $0x64] ss:$8 sps:$4 sm:$0xff]   ;;  %v648_v22 = vld [vmem:[#allocation3 + $0x60] ss:$8 sps:$4 sm:$0xff]   ;;  %v651_v24 = vld [vmem:[#allocation3 + $0x70] ss:$8 sps:$4 sm:$0xff]  }
  0x1b   :  { %62 = vperm.xlu0 %625, %v51_v7   ;;  %434 = vmatprep.subr.bf16.mxu1 %v631_v11  ;;  %v652_v25 = vld [vmem:[#allocation3 + $0x84] ss:$8 sps:$4 sm:$0xff]   ;;  %v654_v26 = vld [vmem:[#allocation3 + $0x80] ss:$8 sps:$4 sm:$0xff]   ;;  %v655_v27 = vld [vmem:[#allocation3 + $0x94] ss:$8 sps:$4 sm:$0xff]  }
  0x1c   :  { %581 = vmatmul.mubr.msk.f32.gmra.mrb[2].mxu0 %vm88_vm0, %v49_v10  ;;  %177 = vperm.xlu1 %626, %v51_v7   ;;  %v657_v28 = vld [vmem:[#allocation3 + $0x90] ss:$8 sps:$4 sm:$0xff]   ;;  %v658_v29 = vld [vmem:[#allocation3 + $0xa4] ss:$8 sps:$4 sm:$0xff]   ;;  %v660_v30 = vld [vmem:[#allocation3 + $0xa0] ss:$8 sps:$4 sm:$0xff]  }
  0x1d   :  { %v661_v31 = vld [vmem:[#allocation3 + $0xb4] ss:$8 sps:$4 sm:$0xff]   ;;  %v663_v32 = vld [vmem:[#allocation3 + $0xb0] ss:$8 sps:$4 sm:$0xff]   ;;  %v664_v33 = vld [vmem:[#allocation3 + $0xc4] ss:$8 sps:$4 sm:$0xff]  }
  0x1e   :  { %435 = vmatpush1.bf16.msra.mxu1 %v633_v12  ;;  %v666_v34 = vld [vmem:[#allocation3 + $0xc0] ss:$8 sps:$4 sm:$0xff]   ;;  %v667_v35 = vld [vmem:[#allocation3 + $0xd4] ss:$8 sps:$4 sm:$0xff]   ;;  %v669_v36 = vld [vmem:[#allocation3 + $0xd0] ss:$8 sps:$4 sm:$0xff]  }
  0x1f   :  { %436 = vmatprep.subr.bf16.mxu1 %v634_v13  ;;  %627 = vset.pattern.permute.xlu0 %v729_v2  ;;  %v670_v37 = vld [vmem:[#allocation3 + $0xe4] ss:$8 sps:$4 sm:$0xff]   ;;  %v672_v38 = vld [vmem:[#allocation3 + $0xe0] ss:$8 sps:$4 sm:$0xff]   ;;  %v673_v39 = vld [vmem:[#allocation3 + $0xf4] ss:$8 sps:$4 sm:$0xff]  }
  0x20   :  { %v675_v40 = vld [vmem:[#allocation3 + $0xf0] ss:$8 sps:$4 sm:$0xff]   ;;  %v813_v43 = vsub.s32 0, %v67_v42  ;;  %v54_v44 = vld [vmem:[%s851_s3] sm:$0xf]  ;;  %v72_v45 = vsub.s32 2, %v67_v42 }
  0x21   :  { %v182_v46 = vsub.s32 1, %v67_v42  ;;  %v186_v47 = vsub.s32 3, %v67_v42  ;;  %v206_v0 = vld [vmem:[%s852_s4] sm:$0x3]  ;;  %s698_s18 = scalar_lea.vmem %s572_s17, 16  ;;  %s702_s19 = scalar_lea.vmem %s572_s17, 32 }
  0x22   :  { %437 = vmatpush1.bf16.msra.mxu1 %v636_v14  ;;  %v69_v48 = vrot.slane %v54_v44, %v813_v43  ;;  %v73_v49 = vrot.slane %v54_v44, %v72_v45  ;;  %v211_v7 = vrot.slane %v206_v0, %v813_v43  ;;  %p699_p8 = scmp.ne.s32.totalorder %s572_s17, %s698_s18  ;;  %p704_p10 = scmp.lt.s32.totalorder %s702_s19, %s698_s18 }
  0x23   :  { %438 = vmatprep.subr.bf16.mxu1 %v637_v15  ;;  %v183_v50 = vrot.slane %v54_v44, %v182_v46  ;;  %v187_v51 = vrot.slane %v54_v44, %v186_v47  ;;  %v215_v11 = vrot.slane %v206_v0, %v182_v46 }
  0x24   :  { %v79_v52 = vrot.slane %v69_v48, %v813_v43  ;;  %v83_v53 = vrot.slane %v73_v49, %v813_v43  ;;  %p705_p11 = por %p704_p10, %p703_p9 }
  0x25   :  { %v193_v55 = vrot.slane %v183_v50, %v182_v46  ;;  %v197_v56 = vrot.slane %v187_v51, %v182_v46 }
  0x26   :  { %439 = vmatpush1.bf16.msra.mxu1 %v639_v16  ;;  %p706_p12 = pnand %p705_p11, %p699_p8 }
  0x27   :  { %440 = vmatprep.subr.bf16.mxu1 %v640_v17 }
  0x2a   :  { %441 = vmatpush1.bf16.msra.mxu1 %v642_v18 }
  0x2b   :  { %442 = vmatprep.subr.bf16.mxu1 %v643_v19 }
  0x2e   :  { %443 = vmatpush1.bf16.msra.mxu1 %v645_v20 }
  0x2f   :  { %444 = vmatprep.subr.bf16.mxu1 %v646_v21 }
  0x32   :  { %445 = vmatpush1.bf16.msra.mxu1 %v648_v22 }
  0x33   :  { %446 = vmatprep.subr.bf16.mxu1 %v649_v23 }
  0x36   :  { %447 = vmatpush1.bf16.msra.mxu1 %v651_v24 }
  0x37   :  { %448 = vmatprep.subr.bf16.mxu1 %v652_v25 }
  0x3a   :  { %449 = vmatpush1.bf16.msra.mxu1 %v654_v26 }
  0x3b   :  { %450 = vmatprep.subr.bf16.mxu1 %v655_v27 }
  0x3e   :  { %451 = vmatpush1.bf16.msra.mxu1 %v657_v28 }
  0x3f   :  { %452 = vmatprep.subr.bf16.mxu1 %v658_v29  ;;  %v479_v29 = vld [vmem:[%s855_s7] sm:$0x3] }
  0x40   :  { %v486_v50 = vrot.slane %v479_v29, %v813_v43 }
  0x42   :  { %453 = vmatpush1.bf16.msra.mxu1 %v660_v30  ;;  %v490_v30 = vrot.slane %v479_v29, %v182_v46 }
  0x43   :  { %454 = vmatprep.subr.bf16.mxu1 %v661_v31  ;;  %v260_v31 = vld [vmem:[%s854_s6] sm:$0x3] }
  0x44   :  { %557 = vmatprep.mubr.f32.mxu0 %v490_v30 }
  0x46   :  { %455 = vmatpush1.bf16.msra.mxu1 %v663_v32  ;;  %v265_v32 = vrot.slane %v260_v31, %v813_v43 }
  0x47   :  { %456 = vmatprep.subr.bf16.mxu1 %v664_v33  ;;  %v269_v33 = vrot.slane %v260_v31, %v182_v46  ;;  %v481_v46 = vstv %s856_s8 }
  0x4a   :  { %457 = vmatpush1.bf16.msra.mxu1 %v666_v34 }
  0x4b   :  { %458 = vmatprep.subr.bf16.mxu1 %v667_v35 }
  0x4e   :  { %459 = vmatpush1.bf16.msra.mxu1 %v669_v36 }
  0x4f   :  { %460 = vmatprep.subr.bf16.mxu1 %v670_v37 }
  0x52   :  { %461 = vmatpush1.bf16.msra.mxu1 %v672_v38 }
  0x53   :  { %462 = vmatprep.subr.bf16.mxu1 %v673_v39 }
  0x56   :  { %463 = vmatpush1.bf16.msra.mxu1 %v675_v40 }
  0x96   :  { %v58_v54 = vpop.permute.xlu0 %57 }
  0x97   :  { %v174_v57 = vpop.permute.xlu1 %173  ;;  %v84_v58 = vmul.f32 %v79_v52, %v58_v54  ;;  %v85_v59 = vmul.f32 %v83_v53, %v58_v54 }
  0x98   :  { %v198_v60 = vmul.f32 %v193_v55, %v174_v57  ;;  %v199_v61 = vmul.f32 %v197_v56, %v174_v57 }
  0x9a   :  { %v63_v62 = vpop.permute.xlu0 %62 }
  0x9b   :  { %v178_v3 = vpop.permute.xlu1 %177  ;;  %v86_v5 = vmul.f32 %v79_v52, %v63_v62  ;;  %v87_v8 = vmul.f32 %v83_v53, %v63_v62 }
  0x9c   :  { %v200_v12 = vmul.f32 %v193_v55, %v178_v3  ;;  %v201_v15 = vmul.f32 %v197_v56, %v178_v3 }
  0xea   :  { %v161_v63 = vpop.f32.mrb[0].mxu0 }
  0xeb   :  { %v162_v1 = vadd.f32 %v161_v63, %v84_v58  ;;  %v163_v2 = vpop.f32.mrb[1].mxu0 }
  0xec   :  { %v164_v4 = vadd.f32 %v163_v2, %v85_v59 }
  0xed   :  { %v202_v6 = vadd.f32 %v198_v60, %v162_v1 }
  0xee   :  { %v203_v9 = vadd.f32 %v199_v61, %v164_v4 }
  0xef   :  { %v167_v10 = vpop.f32.mrb[2].mxu0  ;;  %v218_v17 = vadd.f32 %v211_v7, %v202_v6 }
  0xf0   :  { %v168_v13 = vadd.f32 %v167_v10, %v86_v5  ;;  %v169_v14 = vpop.f32.mrb[3].mxu0  ;;  %v219_v20 = vadd.f32 %v215_v11, %v203_v9 }
  0xf1   :  { %v170_v16 = vadd.f32 %v169_v14, %v87_v8  ;;  %v222_v23 = vmax.f32 %v218_v17, 0.0 }
  0xf2   :  { %v204_v18 = vadd.f32 %v200_v12, %v168_v13  ;;  %v223_v25 = vmax.f32 %v219_v20, 0.0 }
  0xf3   :  { %v205_v19 = vadd.f32 %v201_v15, %v170_v16 }
  0xf4   :  { %v220_v21 = vadd.f32 %v211_v7, %v204_v18 }
  0xf5   :  { %v221_v22 = vadd.f32 %v215_v11, %v205_v19 }
  0xf6   :  { %v224_v24 = vmax.f32 %v220_v21, 0.0 }
  0xf7   :  { %v225_v26 = vmax.f32 %v221_v22, 0.0 }
  0xf8   :  { %v226_v27 = vpack.c.bf16 %v224_v24, %v222_v23 }
  0xf9   :  { %v227_v28 = vpack.c.bf16 %v225_v26, %v223_v25 }
  0xfb   :  { %464 = vmatprep.mubr.bf16.mxu1 %v227_v28 }
  0xfc   :  { %465 = vmatmul.mubr.bf16.vlgmr.msra.gmra.mrb[0].mxu1 %v226_v27 }
 0x1cf   :  { %v466_v34 = vpop.f32.mrb[0].mxu1 }
 0x1d0   :  { %v467_v35 = vadd.f32 %v466_v34, %v265_v32  ;;  %v468_v36 = vpop.f32.mrb[1].mxu1 }
 0x1d1   :  { %v469_v37 = vadd.f32 %v468_v36, %v269_v33  ;;  %v470_v38 = vpop.f32.mrb[2].mxu1 }
 0x1d2   :  { %v471_v39 = vadd.f32 %v470_v38, %v265_v32  ;;  %v472_v40 = vpop.f32.mrb[3].mxu1  ;;  %v475_v42 = vmax.f32 %v467_v35, 0.0 }
 0x1d3   :  { %v473_v41 = vadd.f32 %v472_v40, %v269_v33  ;;  %v476_v45 = vmax.f32 %v469_v37, 0.0 }
 0x1d4   :  { %v477_v44 = vmax.f32 %v471_v39, 0.0 }
 0x1d5   :  { %v478_v47 = vmax.f32 %v473_v41, 0.0 }
 0x1d6   :  { %v616_v48 = vpack.c.bf16 %v477_v44, %v475_v42 }
 0x1d7   :  { %v614_v49 = vpack.c.bf16 %v478_v47, %v476_v45 }
 0x1d9   :  { %615 = vmatprep.subr.bf16.mxu0 %v614_v49 }
 0x1da   :  { %617 = vmatpush1.bf16.xpose.msra.mxu0 %v616_v48 }
 0x1e1   :  { %558 = vmatmul.mubr.f32.vlgmr.msra.gmra.mrb[4].mxu0 %v486_v50 }
 0x2b4   :  { %v559_v51 = vpop.f32.mrb[4].mxu0 }
 0x2b5   :  { %v560_v52 = vadd.f32 %v559_v51, %v481_v46  ;;  %v561_v53 = vpop.f32.mrb[5].mxu0 }
 0x2b7   :  { %564 = vst.msk [vmem:[#allocation6] sm:$0x1] %vm563_vm1, %v560_v52 }
 0x2b8   :  { %709 = shalt.err (!%p706_p12)
}
 0x2b9   :  { %s710_s8 = scalar_lea.hbm %s857_s9, 16 }
 0x2ba   :  { %p711_p13 = scmp.ne.s32.totalorder %s857_s9, %s710_s8  ;;  %p714_p0 = scmp.lt.u32.totalorder %s710_s8, %s857_s9 }
 0x2bc   :  { %p716_p1 = pnand %p714_p0, %p711_p13 }
 0x2be   :  { %719 = shalt.err (!%p716_p1)
}
 0x2bf   :  { %574 = dma.vmem_to_hbm [thread:$0]  %s572_s17, 16, %s857_s9, [#allocation5]  }
 0x2c0   :  { %722 = dma.done.wait [#allocation5], 16  }
 0x2c1   :  { %723 = vsyncadd [#allocation5], 4294967280 }
 0x2c2   :  { %578 = vsyncpa [#allocation4], 1 }
 0x2c3   :  { %579 = vsyncpa [#allocation5], 1 }

</bundles_post_ra>
